<compile_context>
chip_gen: v7x
topology: tpu7x:2x2x1
jax: 0.10.0
libtpu: 0.0.40
codegen_flags: <defaults>
</compile_context>

<pallas_src>
import jax
import jax.numpy as jnp
import numpy as np
from jax.experimental import pallas as pl
from jax.experimental.pallas import tpu as pltpu


def _simple_arch_kernel(x_ref, t_ref, cb_ref, hw_ref, hb_ref, o_ref):
    """Fused (conv-as-matmul) + bias + ReLU + head matmul + bias.

    x_ref : VMEM (TB, L_in)           input tile (channel dim squeezed)
    t_ref : VMEM (L_in, L_out_pad)    Toeplitz conv matrix (resident)
    cb_ref: VMEM (1, L_out_pad)       conv bias broadcast (zero past L_out)
    hw_ref: VMEM (L_out_pad, O)       head weight, transposed, zero-padded rows
    hb_ref: VMEM (1, O)               head bias
    o_ref : VMEM (TB, O)              output tile
    """
    # Conv1d(1->1, k) over the whole tile as a single MXU matmul.
    conv = jnp.dot(x_ref[...], t_ref[...], preferred_element_type=jnp.float32)
    conv = jnp.maximum(conv + cb_ref[...], 0.0)           # bias + ReLU (VPU)
    # Head: (TB, L_out_pad) @ (L_out_pad, O) + bias       (second MXU matmul)
    out = jnp.dot(conv, hw_ref[...], preferred_element_type=jnp.float32)
    o_ref[...] = (out + hb_ref[...]).astype(o_ref.dtype)


def _round_up(n, m):
    return ((n + m - 1) // m) * m


def prepare_params(conv_w, conv_b, head_w, head_b, input_size):
    """One-time parameter prep (hoisted out of the per-call forward path).

    conv_w: (1, 1, filter_size)   conv_b: (1,)
    head_w: (output_size, L_out)  head_b: (output_size,)   (PyTorch layouts)
    """
    filter_size = conv_w.shape[-1]
    l_out = input_size - filter_size + 1
    assert head_w.shape[1] == l_out
    out_size = head_w.shape[0]
    l_out_pad = _round_up(l_out, 8)          # sublane-align head contraction dim

    # Toeplitz matrix: out[j] = sum_k x[j + k] * taps[k]  =>  T[i, j] = taps[i - j]
    taps = conv_w.reshape(filter_size).astype(jnp.float32)
    i = jnp.arange(input_size)[:, None]
    j = jnp.arange(l_out_pad)[None, :]
    k = i - j
    valid = (k >= 0) & (k < filter_size) & (j < l_out)
    toeplitz = jnp.where(valid, taps[jnp.clip(k, 0, filter_size - 1)], 0.0)
    toeplitz = toeplitz.astype(jnp.float32)                 # (L_in, L_out_pad)

    # Conv bias broadcast over the real output positions (padded cols stay 0,
    # so after ReLU the padded columns remain exactly 0).
    cb = jnp.where(jnp.arange(l_out_pad) < l_out,
                   conv_b.astype(jnp.float32)[0], 0.0).reshape(1, l_out_pad)

    # Head weight transposed + zero-padded rows so padded conv columns contribute 0.
    hw = jnp.zeros((l_out_pad, out_size), jnp.float32)
    hw = hw.at[:l_out, :].set(head_w.T.astype(jnp.float32))
    hb = head_b.reshape(1, out_size).astype(jnp.float32)

    return dict(toeplitz=toeplitz, conv_bias=cb, head_w=hw, head_b=hb,
                input_size=input_size, out_size=out_size)


def simple_architecture_forward(x, params, *, block_batch=512):
    """x: (B, 1, L_in) float32, PyTorch-style NCW. Returns (B, output_size) float32."""
    B, C, L_in = x.shape
    assert C == 1 and L_in == params["input_size"]
    out_size = params["out_size"]
    toeplitz = params["toeplitz"]
    cb = params["conv_bias"]
    hw = params["head_w"]
    hb = params["head_b"]
    l_out_pad = toeplitz.shape[1]

    x2 = x.reshape(B, L_in).astype(jnp.float32)

    # Batch tile: large (512) to amortize per-step overhead, shrunk for small B
    # (kept a multiple of 8 for sublane alignment; Pallas masks partial blocks).
    tb = min(block_batch, _round_up(B, 8))
    grid = (pl.cdiv(B, tb),)

    return pl.pallas_call(
        _simple_arch_kernel,
        out_shape=jax.ShapeDtypeStruct((B, out_size), jnp.float32),
        grid=grid,
        in_specs=[
            pl.BlockSpec((tb, L_in), lambda i: (i, 0)),             # x tile (pipelined)
            pl.BlockSpec((L_in, l_out_pad), lambda i: (0, 0)),      # Toeplitz (resident)
            pl.BlockSpec((1, l_out_pad), lambda i: (0, 0)),         # conv bias
            pl.BlockSpec((l_out_pad, out_size), lambda i: (0, 0)),  # head weight
            pl.BlockSpec((1, out_size), lambda i: (0, 0)),          # head bias
        ],
        out_specs=pl.BlockSpec((tb, out_size), lambda i: (i, 0)),
        compiler_params=pltpu.CompilerParams(
            dimension_semantics=("parallel",)),                     # megacore on v7x
    )(x2, toeplitz, cb, hw, hb)


def _reference_forward(x, conv_w, conv_b, head_w, head_b):
    """Plain-JAX reference mirroring the PyTorch forward."""
    B, _, L_in = x.shape
    fs = conv_w.shape[-1]
    l_out = L_in - fs + 1
    x2 = x[:, 0, :]
    conv = jnp.zeros((B, l_out), jnp.float32)
    for k in range(fs):
        conv = conv + x2[:, k:k + l_out] * conv_w[0, 0, k]
    conv = jnp.maximum(conv + conv_b[0], 0.0)
    return conv @ head_w.T + head_b


if __name__ == "__main__":
    # Small shapes consistent with the module:
    #   input_size=32, filter_size=5, output_size=16, batch=8
    BATCH = 8
    INPUT_SIZE = 32
    FILTER_SIZE = 5
    OUTPUT_SIZE = 16
    L_OUT = INPUT_SIZE - FILTER_SIZE + 1

    key = jax.random.PRNGKey(0)
    k_x, k_cw, k_cb, k_hw, k_hb = jax.random.split(key, 5)

    # Deterministic synthetic params (roughly PyTorch uniform fan-in scaling).
    x = jax.random.normal(k_x, (BATCH, 1, INPUT_SIZE), dtype=jnp.float32)
    conv_bound = 1.0 / np.sqrt(FILTER_SIZE)
    conv_w = jax.random.uniform(k_cw, (1, 1, FILTER_SIZE), jnp.float32,
                                -conv_bound, conv_bound)
    conv_b = jax.random.uniform(k_cb, (1,), jnp.float32, -conv_bound, conv_bound)
    head_bound = 1.0 / np.sqrt(L_OUT)
    head_w = jax.random.uniform(k_hw, (OUTPUT_SIZE, L_OUT), jnp.float32,
                                -head_bound, head_bound)
    head_b = jax.random.uniform(k_hb, (OUTPUT_SIZE,), jnp.float32,
                                -head_bound, head_bound)

    # Parameter prep happens once, outside the per-call forward path.
    params = prepare_params(conv_w, conv_b, head_w, head_b, INPUT_SIZE)

    out = simple_architecture_forward(x, params)
    out = jax.block_until_ready(out)

    ref = _reference_forward(x, conv_w, conv_b, head_w, head_b)
    np.testing.assert_allclose(np.asarray(out), np.asarray(ref), rtol=1e-5, atol=1e-5)

    print("KERNEL_OK")
</pallas_src>

<mosaic_0001>
module attributes {stable_mosaic.version = 11 : i64} {
  func.func @_simple_arch_kernel(%arg0: i32, %arg1: memref<8x32xf32, #tpu.memory_space<vmem>>, %arg2: memref<32x32xf32, #tpu.memory_space<vmem>>, %arg3: memref<1x32xf32, #tpu.memory_space<vmem>>, %arg4: memref<32x16xf32, #tpu.memory_space<vmem>>, %arg5: memref<1x16xf32, #tpu.memory_space<vmem>>, %arg6: memref<8x16xf32, #tpu.memory_space<vmem>>) attributes {dimension_semantics = [#tpu.dimension_semantics<parallel>], iteration_bounds = array<i64: 1>, scalar_prefetch = 0 : i64, scratch_operands = 0 : i64, tpu.core_type = #tpu.core_type<tc>, window_params = [{transform_indices = @transform_0, window_bounds = array<i64: 8, 32>}, {pipeline_mode = #tpu.pipeline_mode<synchronous>, transform_indices = @transform_1, window_bounds = array<i64: 32, 32>}, {pipeline_mode = #tpu.pipeline_mode<synchronous>, transform_indices = @transform_2, window_bounds = array<i64: 1, 32>}, {pipeline_mode = #tpu.pipeline_mode<synchronous>, transform_indices = @transform_3, window_bounds = array<i64: 32, 16>}, {pipeline_mode = #tpu.pipeline_mode<synchronous>, transform_indices = @transform_4, window_bounds = array<i64: 1, 16>}, {transform_indices = @transform_5, window_bounds = array<i64: 8, 16>}]} {
    %c0 = arith.constant 0 : index
    %c0_0 = arith.constant 0 : index
    %0 = vector.load %arg1[%c0, %c0_0] : memref<8x32xf32, #tpu.memory_space<vmem>>, vector<8x32xf32>
    %c0_1 = arith.constant 0 : index
    %c0_2 = arith.constant 0 : index
    %1 = vector.load %arg2[%c0_1, %c0_2] : memref<32x32xf32, #tpu.memory_space<vmem>>, vector<32x32xf32>
    %cst = arith.constant dense<0.000000e+00> : vector<8x32xf32>
    %2 = tpu.matmul %0, %1, %cst {dimension_numbers = #tpu.dot_dimension_numbers<[1], [0], [0], [1], [0, 0, 1, 1], [], []>} : vector<8x32xf32>, vector<32x32xf32>, vector<8x32xf32> -> vector<8x32xf32>
    %c0_3 = arith.constant 0 : index
    %c0_4 = arith.constant 0 : index
    %3 = vector.load %arg3[%c0_3, %c0_4] : memref<1x32xf32, #tpu.memory_space<vmem>>, vector<1x32xf32>
    %4 = vector.broadcast %3 : vector<1x32xf32> to vector<8x32xf32>
    %5 = arith.addf %2, %4 : vector<8x32xf32>
    %cst_5 = arith.constant 0.000000e+00 : f32
    %6 = vector.broadcast %cst_5 : f32 to vector<8x32xf32>
    %7 = arith.maximumf %5, %6 : vector<8x32xf32>
    %c0_6 = arith.constant 0 : index
    %c0_7 = arith.constant 0 : index
    %8 = vector.load %arg4[%c0_6, %c0_7] : memref<32x16xf32, #tpu.memory_space<vmem>>, vector<32x16xf32>
    %cst_8 = arith.constant dense<0.000000e+00> : vector<8x16xf32>
    %9 = tpu.matmul %7, %8, %cst_8 {dimension_numbers = #tpu.dot_dimension_numbers<[1], [0], [0], [1], [0, 0, 1, 1], [], []>} : vector<8x32xf32>, vector<32x16xf32>, vector<8x16xf32> -> vector<8x16xf32>
    %c0_9 = arith.constant 0 : index
    %c0_10 = arith.constant 0 : index
    %10 = vector.load %arg5[%c0_9, %c0_10] : memref<1x16xf32, #tpu.memory_space<vmem>>, vector<1x16xf32>
    %11 = vector.broadcast %10 : vector<1x16xf32> to vector<8x16xf32>
    %12 = arith.addf %9, %11 : vector<8x16xf32>
    %c0_11 = arith.constant 0 : index
    %c0_12 = arith.constant 0 : index
    %13 = vector.load %arg6[%c0_11, %c0_12] : memref<8x16xf32, #tpu.memory_space<vmem>>, vector<8x16xf32>
    tpu.vector_store %arg6[%c0_11, %c0_12], %12 {strides = array<i32>} : memref<8x16xf32, #tpu.memory_space<vmem>>, vector<8x16xf32>,
    return
  }
  func.func @transform_0(%arg0: i32) -> (i32, i32) {
    %c0_i32 = arith.constant 0 : i32
    %c0_i32_0 = arith.constant 0 : i32
    return %arg0, %c0_i32 : i32, i32
  }
  func.func @transform_1(%arg0: i32) -> (i32, i32) {
    %c0_i32 = arith.constant 0 : i32
    %c0_i32_0 = arith.constant 0 : i32
    %c0_i32_1 = arith.constant 0 : i32
    return %c0_i32, %c0_i32_0 : i32, i32
  }
  func.func @transform_2(%arg0: i32) -> (i32, i32) {
    %c0_i32 = arith.constant 0 : i32
    %c0_i32_0 = arith.constant 0 : i32
    %c0_i32_1 = arith.constant 0 : i32
    return %c0_i32, %c0_i32_0 : i32, i32
  }
  func.func @transform_3(%arg0: i32) -> (i32, i32) {
    %c0_i32 = arith.constant 0 : i32
    %c0_i32_0 = arith.constant 0 : i32
    %c0_i32_1 = arith.constant 0 : i32
    return %c0_i32, %c0_i32_0 : i32, i32
  }
  func.func @transform_4(%arg0: i32) -> (i32, i32) {
    %c0_i32 = arith.constant 0 : i32
    %c0_i32_0 = arith.constant 0 : i32
    %c0_i32_1 = arith.constant 0 : i32
    return %c0_i32, %c0_i32_0 : i32, i32
  }
  func.func @transform_5(%arg0: i32) -> (i32, i32) {
    %c0_i32 = arith.constant 0 : i32
    %c0_i32_0 = arith.constant 0 : i32
    return %arg0, %c0_i32 : i32, i32
  }
}

</mosaic_0001>

<bundles_post_ra>
// kernel: tpu_custom_call.1
= control target key start
LH: loop header
LB: loop body
LE: loop exit
PB: predicated region body
PF: predicated region fallthrough
CT: control target
= control target key end

     0   :  { %v284_v3 = vmov 0.0|0.0   ;;  %vm285_vm0 = vmmov 0   ;;  %v286_v6 = vmov 0.0   ;;  %s363_s0 = inlined_call_operand.vmem [shape: f32[8,32], index: 0, kind: input, shape index: {}]   ;;  %s364_s1 = inlined_call_operand.vmem [shape: f32[32,32], index: 1, kind: input, shape index: {}]   ;;  %s365_s2 = inlined_call_operand.vmem [shape: f32[1,32], index: 2, kind: input, shape index: {}]   ;;  %s366_s3 = inlined_call_operand.vmem [shape: f32[32,16], index: 3, kind: input, shape index: {}]   ;;  %s367_s4 = inlined_call_operand.vmem [shape: f32[1,16], index: 4, kind: input, shape index: {}]   ;;  %s368_s5 = inlined_call_operand.hbm [shape: f32[8,16], index: 5, kind: output, shape index: {}]  }
   0x1   :  { %v22_v0 = vld [vmem:[%s364_s1] sm:$0xff]  ;;  %v23_v1 = vld [vmem:[%s364_s1 + $0x8] sm:$0xff]  ;;  %v24_v2 = vld [vmem:[%s364_s1 + $0x10] sm:$0xff]  ;;  %244 = vmatprep.subr.bf16.mxu0 %v284_v3  ;;  %230 = vmatprep.mubr.msk.f32.mxu0 %vm285_vm0, %v286_v6 }
   0x2   :  { %v245_v4 = vpack.c.bf16 %v23_v1, %v22_v0  ;;  %v25_v5 = vld [vmem:[%s364_s1 + $0x18] sm:$0xff]  ;;  %v108_v7 = vld [vmem:[%s366_s3] sm:$0xff]  ;;  %250 = vmatprep.subr.bf16.mxu1 %v284_v3  ;;  %v109_v8 = vld [vmem:[%s366_s3 + $0x8] sm:$0xff]  ;;  %241 = vmatprep.mubr.msk.f32.mxu1 %vm285_vm0, %v286_v6 }
   0x3   :  { %10 = vsyncpa [#allocation3], 0  ;;  %v248_v9 = vpack.c.bf16 %v25_v5, %v24_v2  ;;  %v251_v10 = vpack.c.bf16 %v109_v8, %v108_v7  ;;  %v21_v11 = vld [vmem:[%s363_s0] sm:$0xff]  ;;  %vm33_vm1 = vcmask 261120   ;;  %v110_v12 = vld [vmem:[%s366_s3 + $0x10] sm:$0xff]  ;;  %s287_s13 = smov [#allocation2]  }
   0x4   :  { %246 = vmatpush3.bf16.msra.mxu0 %v245_v4  ;;  %v111_v13 = vld [vmem:[%s366_s3 + $0x18] sm:$0xff]  ;;  %v208_v15 = vld [vmem:[%s365_s2] ss:$0 sm:$0xff]  ;;  %s200_s14 = sshll.u32 %s287_s13, 4  ;;  %vm192_vm2 = vcmask 130048   ;;  %s201_s14 = int_to_ptr.vmem [resolvable:$true] %s200_s14 }
   0x5   :  { %247 = vmatprep.subr.bf16.mxu0 %v284_v3  ;;  %252 = vmatpush3.bf16.msra.mxu1 %v251_v10  ;;  %v254_v14 = vpack.c.bf16 %v111_v13, %v110_v12  ;;  %v210_v20 = vld [vmem:[%s367_s4] ss:$0 sm:$0xff]  ;;  %s260_s3 = scalar_lea.vmem %s201_s14, 128  ;;  %p265_p1 = scmp.lt.s32.totalorder %s201_s14, %s201_s14 }
   0x6   :  { %253 = vmatprep.subr.bf16.mxu1 %v284_v3  ;;  %p261_p0 = scmp.ne.s32.totalorder %s201_s14, %s260_s3  ;;  %p266_p2 = scmp.lt.s32.totalorder %s260_s3, %s260_s3 }
   0x8   :  { %249 = vmatpush3.bf16.msra.mxu0 %v248_v9  ;;  %p267_p3 = por %p266_p2, %p265_p1 }
   0x9   :  { %255 = vmatpush3.bf16.msra.mxu1 %v254_v14 }
   0xa   :  { %p268_p4 = pnand %p267_p3, %p261_p0 }
   0xb   :  { %231 = vmatmul.mubr.msk.f32.vlgmr.msra.gmra.mrb[0].mxu0 %vm33_vm1, %v21_v11 }
  0xde   :  { %v103_v16 = vpop.f32.mrb[0].mxu0 }
  0xdf   :  { %v104_v17 = vadd.f32 %v208_v15, %v103_v16  ;;  %v232_v18 = vpop.f32.mrb[1].mxu0 }
  0xe1   :  { %v107_v19 = vmax.f32 %v104_v17, 0.0 }
  0xe3   :  { %242 = vmatmul.mubr.msk.f32.vlgmr.msra.gmra.mrb[0].mxu1 %vm33_vm1, %v107_v19 }
 0x1b6   :  { %v188_v21 = vpop.f32.mrb[0].mxu1 }
 0x1b7   :  { %v189_v22 = vadd.f32 %v210_v20, %v188_v21  ;;  %v243_v23 = vpop.f32.mrb[1].mxu1 }
 0x1b9   :  { %193 = vst.msk [vmem:[#allocation2] sm:$0xff] %vm192_vm2, %v189_v22 }
 0x1ba   :  { %271 = shalt.err (!%p268_p4)
}
 0x1bb   :  { %s272_s16 = scalar_lea.hbm %s368_s5, 128 }
 0x1bc   :  { %p273_p5 = scmp.ne.s32.totalorder %s368_s5, %s272_s16  ;;  %p276_p6 = scmp.lt.u32.totalorder %s272_s16, %s368_s5 }
 0x1be   :  { %p278_p7 = pnand %p276_p6, %p273_p5 }
 0x1c0   :  { %281 = shalt.err (!%p278_p7)
}
 0x1c1   :  { %203 = dma.vmem_to_hbm [thread:$0]  %s201_s14, 128, %s368_s5, [#allocation3]  }
 0x1c2   :  { %282 = dma.done.wait [#allocation3], 128  }
 0x1c3   :  { %283 = vsyncadd [#allocation3], 4294967168 }
 0x1c4   :  { %207 = vsyncpa [#allocation3], 1 }

</bundles_post_ra>
